<compile_context>
chip_gen: v7x
topology: tpu7x:2x2x1
jax: 0.10.0
libtpu: 0.0.40
codegen_flags: <defaults>
</compile_context>

<pallas_src>
import math
import functools
from typing import NamedTuple

import jax
import jax.numpy as jnp
from jax.experimental import pallas as pl
from jax.experimental.pallas import tpu as pltpu


# ---------------------------------------------------------------------------
# Sinusoidal table — identical math to the torch __init__.
# ---------------------------------------------------------------------------
def make_pos_embedding(emb_size: int, maxlen: int = 5000) -> jnp.ndarray:
    den = jnp.exp(-jnp.arange(0, emb_size, 2, dtype=jnp.float32)
                  * (math.log(10000.0) / emb_size))                     # [emb/2]
    pos = jnp.arange(0, maxlen, dtype=jnp.float32).reshape(maxlen, 1)   # [maxlen,1]
    angles = pos * den                                                  # [maxlen, emb/2]
    pe = jnp.zeros((maxlen, emb_size), dtype=jnp.float32)
    pe = pe.at[:, 0::2].set(jnp.sin(angles))
    pe = pe.at[:, 1::2].set(jnp.cos(angles))
    return pe  # torch's extra unsqueeze(-2) broadcast is folded into the layout


# ---------------------------------------------------------------------------
# Lane-dense 2-D layout selection.
# ---------------------------------------------------------------------------
class _Layout(NamedTuple):
    rows: int        # rows of the 2-D view
    row_width: int   # total columns of the 2-D view (rows*row_width == seq*batch*emb)
    cw: int          # lane width of one column block (multiple of 128 when possible)
    g: int           # sequence rows folded into the lane axis (1 = no folding)


def _choose_layout(seq: int, batch: int, emb: int) -> _Layout:
    total_cols = batch * emb
    # (a) column blocks spanning whole batch items with a 128-multiple lane width.
    for d in range(1, batch + 1):
        if batch % d == 0 and (d * emb) % 128 == 0:
            return _Layout(rows=seq, row_width=total_cols, cw=d * emb, g=1)
    # (b) fold g sequence rows into the lane axis (g | seq, g*total_cols % 128 == 0).
    for g in range(2, seq + 1):
        if seq % g == 0 and (g * total_cols) % 128 == 0:
            return _Layout(rows=seq // g, row_width=g * total_cols,
                           cw=g * total_cols, g=g)
    # (c) fallback: full-width blocks (masked stores, still correct).
    return _Layout(rows=seq, row_width=total_cols, cw=total_cols, g=1)


def _build_pos_slab(pos_embedding: jnp.ndarray, seq: int, batch: int, emb: int,
                    layout: _Layout, x_dtype) -> jnp.ndarray:
    """(rows, cw) pos slab matching the 2-D layout; bf16 when x is bf16."""
    pos_dtype = jnp.bfloat16 if x_dtype == jnp.bfloat16 else jnp.float32
    pos = pos_embedding[:seq].astype(pos_dtype)                    # (seq, emb)
    if layout.g > 1:
        # full width, then fold row groups into the lane axis
        return jnp.tile(pos, (1, batch)).reshape(layout.rows, layout.cw)
    reps = layout.cw // emb
    return pos if reps == 1 else jnp.tile(pos, (1, reps))          # (seq, cw)


# ---------------------------------------------------------------------------
# Generation-aware VMEM budget.
# ---------------------------------------------------------------------------
def _vmem_budget():
    """Return (max_block_bytes, vmem_limit_bytes) for this TPU generation."""
    try:
        vmem_phys = int(pltpu.get_tpu_info().vmem_capacity_bytes)
    except Exception:
        vmem_phys = None
    if vmem_phys is None:
        return 2 * 1024 * 1024, 32 * 1024 * 1024          # unknown: conservative
    vmem_limit = min(64 * 1024 * 1024, max(32 * 1024 * 1024, vmem_phys // 2))
    max_block = 4 * 1024 * 1024 if vmem_limit >= 64 * 1024 * 1024 else 2 * 1024 * 1024
    return max_block, vmem_limit                          # v5e/v6e: 4 MiB/64 MiB; v7x: 2/32


# ---------------------------------------------------------------------------
# Hardware-PRNG availability probe (compiled once, cached).
# ---------------------------------------------------------------------------
@functools.lru_cache(maxsize=1)
def _hw_prng_available() -> bool:
    if jax.default_backend() != "tpu":
        return False

    def _probe(seed_ref, x_ref, o_ref):
        pltpu.prng_seed(seed_ref[0])
        bits = pltpu.prng_random_bits(x_ref.shape).astype(jnp.uint32)
        o_ref[...] = jnp.where(bits >= jnp.uint32(1 << 30), x_ref[...],
                               jnp.float32(0.0))

    try:
        fn = pl.pallas_call(
            _probe,
            out_shape=jax.ShapeDtypeStruct((8, 128), jnp.float32),
            grid_spec=pltpu.PrefetchScalarGridSpec(
                num_scalar_prefetch=1,
                grid=(1,),
                in_specs=[pl.BlockSpec((8, 128), lambda i, s: (0, 0))],
                out_specs=pl.BlockSpec((8, 128), lambda i, s: (0, 0)),
            ),
        )
        jax.jit(fn).lower(jnp.zeros((1,), jnp.int32),
                          jnp.zeros((8, 128), jnp.float32)).compile()
        return True
    except Exception:
        return False


# ---------------------------------------------------------------------------
# Kernel.
# ---------------------------------------------------------------------------
def _pos_enc_kernel(seed_ref, x_ref, pos_ref, o_ref, *,
                    dropout_p: float, training: bool, row_width: int,
                    use_hw_prng: bool):
    # x_ref / pos_ref / o_ref: (ts, cw) VMEM tiles; seed_ref: (1,) int32 in SMEM.
    y = x_ref[...].astype(jnp.float32) + pos_ref[...].astype(jnp.float32)

    if training and dropout_p > 0.0:
        ts, cw = y.shape
        # keep iff u32 >= round(p * 2^32)   (P(drop) = p to within 2^-32)
        thresh = jnp.uint32(min(int(round(dropout_p * float(1 << 32))),
                                (1 << 32) - 1))

        if use_hw_prng:
            # On-chip PRNG: one draw + compare + select per element; stream is
            # re-seeded per tile so neighbouring tiles are independent.
            pltpu.prng_seed(seed_ref[0]
                            + pl.program_id(0) * jnp.int32(65537)
                            + pl.program_id(1) * jnp.int32(257))
            bits = pltpu.prng_random_bits((ts, cw)).astype(jnp.uint32)
        else:
            # Counter-based lowbias32 hash of the global flat element index:
            # deterministic for a given (seed, layout) regardless of tiling.
            row0 = pl.program_id(0) * ts
            col0 = pl.program_id(1) * cw
            r = jax.lax.broadcasted_iota(jnp.int32, (ts, cw), 0)
            k = jax.lax.broadcasted_iota(jnp.int32, (ts, cw), 1)
            gr = (row0 + r).astype(jnp.uint32)
            gc = (col0 + k).astype(jnp.uint32)
            if row_width & (row_width - 1) == 0:
                idx = (gr << (row_width.bit_length() - 1)) + gc   # strength-reduced
            else:
                idx = gr * jnp.uint32(row_width) + gc
            h = idx + seed_ref[0].astype(jnp.uint32) * jnp.uint32(0x9E3779B9)
            h = h ^ (h >> 16)
            h = h * jnp.uint32(0x7FEB352D)
            h = h ^ (h >> 15)
            h = h * jnp.uint32(0x846CA68B)
            h = h ^ (h >> 16)
            bits = h

        keep = bits >= thresh
        scale = jnp.float32(1.0 / (1.0 - dropout_p))
        y = jnp.where(keep, y * scale, jnp.float32(0.0))

    o_ref[...] = y.astype(o_ref.dtype)


# ---------------------------------------------------------------------------
# pallas_call builder on the 2-D lane-dense view.
# ---------------------------------------------------------------------------
def _pos_enc_2d(x2: jnp.ndarray, pos_slab: jnp.ndarray, layout: _Layout, *,
                dropout_p: float, training: bool, seed: int,
                use_hw_prng: bool) -> jnp.ndarray:
    rows, row_width = x2.shape
    cw = layout.cw
    n_col_blocks = row_width // cw

    max_block_bytes, vmem_limit = _vmem_budget()
    bytes_per_row = cw * 4                       # budget as f32 (conservative for bf16)
    ts = max(1, max_block_bytes // bytes_per_row)
    if n_col_blocks == 1:
        # keep ~4 row blocks so a 2-TensorCore chip (v7x) can split the grid
        ts = min(ts, max(1, -(-rows // 4)))
    if ts < rows:
        ts = max(8, (ts // 8) * 8)               # sublane-aligned partial blocks
    ts = min(ts, rows)                           # full-dim block is always legal

    grid = (pl.cdiv(rows, ts), n_col_blocks)
    seed_arr = jnp.asarray([seed], dtype=jnp.int32)

    kernel = functools.partial(
        _pos_enc_kernel,
        dropout_p=float(dropout_p),
        training=bool(training),
        row_width=int(row_width),
        use_hw_prng=bool(use_hw_prng),
    )

    return pl.pallas_call(
        kernel,
        out_shape=jax.ShapeDtypeStruct((rows, row_width), x2.dtype),
        grid_spec=pltpu.PrefetchScalarGridSpec(
            num_scalar_prefetch=1,
            grid=grid,
            in_specs=[
                # x: streamed tile per (row, col) grid point.
                pl.BlockSpec((ts, cw), lambda i, c, sref: (i, c)),
                # pos: index_map independent of the column axis -> stays resident
                # in VMEM across column iterations (no re-DMA).
                pl.BlockSpec((ts, cw), lambda i, c, sref: (i, 0)),
            ],
            out_specs=pl.BlockSpec((ts, cw), lambda i, c, sref: (i, c)),
        ),
        compiler_params=pltpu.CompilerParams(
            dimension_semantics=("parallel", "parallel"),
            vmem_limit_bytes=vmem_limit,
        ),
    )(seed_arr, x2, pos_slab)


# ---------------------------------------------------------------------------
# Module-like wrapper (pos table + pos slab hoisted/cached, like a torch buffer).
# ---------------------------------------------------------------------------
class PositionalEncoder:
    def __init__(self, emb_size: int, dropout: float = 0.1, maxlen: int = 5000):
        assert 0.0 <= dropout < 1.0, "dropout must be in [0, 1)"
        self.emb_size = int(emb_size)
        self.dropout_p = float(dropout)
        self.maxlen = int(maxlen)
        self.pos_embedding = make_pos_embedding(self.emb_size, self.maxlen)
        self._slab_cache = {}

    def _layout_and_slab(self, seq: int, batch: int, dtype):
        key = (seq, batch, jnp.dtype(dtype).name)
        hit = self._slab_cache.get(key)
        if hit is None:
            layout = _choose_layout(seq, batch, self.emb_size)
            slab = _build_pos_slab(self.pos_embedding, seq, batch,
                                   self.emb_size, layout, dtype)
            hit = (layout, slab)
            self._slab_cache[key] = hit
        return hit

    def __call__(self, x: jnp.ndarray, *, training: bool = False, seed: int = 0,
                 prefer_hw_prng: bool = True) -> jnp.ndarray:
        seq, batch, emb = x.shape
        assert emb == self.emb_size and seq <= self.maxlen
        layout, slab = self._layout_and_slab(seq, batch, x.dtype)
        x2 = x.reshape(layout.rows, layout.row_width)   # free, row-major-preserving
        use_hw = (training and self.dropout_p > 0.0 and prefer_hw_prng
                  and _hw_prng_available())
        out2 = _pos_enc_2d(x2, slab, layout,
                           dropout_p=self.dropout_p, training=training,
                           seed=seed, use_hw_prng=use_hw)
        return out2.reshape(seq, batch, emb)


def positional_encoder(x, pos_embedding, *, dropout_p: float = 0.1,
                       training: bool = False, seed: int = 0,
                       prefer_hw_prng: bool = True) -> jnp.ndarray:
    """One-shot functional wrapper (builds the pos slab per call; prefer the
    PositionalEncoder class for repeated use so the slab is hoisted)."""
    seq, batch, emb = x.shape
    layout = _choose_layout(seq, batch, emb)
    slab = _build_pos_slab(pos_embedding, seq, batch, emb, layout, x.dtype)
    x2 = x.reshape(layout.rows, layout.row_width)
    use_hw = (training and dropout_p > 0.0 and prefer_hw_prng
              and _hw_prng_available())
    out2 = _pos_enc_2d(x2, slab, layout, dropout_p=dropout_p,
                       training=training, seed=seed, use_hw_prng=use_hw)
    return out2.reshape(seq, batch, emb)


if __name__ == "__main__":
    SEQ, BATCH, EMB, MAXLEN = 8, 2, 32, 64
    P = 0.1

    key = jax.random.PRNGKey(0)
    x = jax.random.normal(key, (SEQ, BATCH, EMB), dtype=jnp.float32)

    enc = PositionalEncoder(EMB, dropout=P, maxlen=MAXLEN)

    # Eval mode (dropout identity), matching module.eval() in PyTorch.
    out = jax.block_until_ready(enc(x, training=False))
    ref = x + enc.pos_embedding[:SEQ][:, None, :]
    assert out.shape == x.shape
    assert jnp.allclose(out, ref, atol=1e-6, rtol=1e-6), "eval-mode mismatch"

    # Train mode: each element is 0 (dropped) or ref/(1-p) (kept & rescaled).
    out_train = jax.block_until_ready(enc(x, training=True, seed=123))
    assert out_train.shape == x.shape
    scaled = ref / (1.0 - P)
    ok = jnp.isclose(out_train, scaled, atol=1e-5, rtol=1e-5) | (out_train == 0.0)
    assert bool(jnp.all(ok)), "train-mode outputs not in {0, ref/(1-p)}"
    keep_frac = float(jnp.mean((out_train != 0.0).astype(jnp.float32)))
    assert 0.5 < keep_frac <= 1.0, f"implausible keep fraction {keep_frac}"

    print("KERNEL_OK")
</pallas_src>

<mosaic_0001>
module attributes {stable_mosaic.version = 11 : i64} {
  func.func @_pos_enc_kernel(%arg0: i32, %arg1: i32, %arg2: memref<1xi32, #tpu.memory_space<smem>>, %arg3: memref<4x128xf32, #tpu.memory_space<vmem>>, %arg4: memref<4x128xf32, #tpu.memory_space<vmem>>, %arg5: memref<4x128xf32, #tpu.memory_space<vmem>>) attributes {dimension_semantics = [#tpu.dimension_semantics<parallel>, #tpu.dimension_semantics<parallel>], iteration_bounds = array<i64: 1, 1>, scalar_prefetch = 1 : i64, scratch_operands = 0 : i64, tpu.core_type = #tpu.core_type<tc>, window_params = [{transform_indices = @transform_0, window_bounds = array<i64: 4, 128>}, {transform_indices = @transform_1, window_bounds = array<i64: 4, 128>}, {transform_indices = @transform_2, window_bounds = array<i64: 4, 128>}]} {
    %c0 = arith.constant 0 : index
    %c0_0 = arith.constant 0 : index
    %0 = vector.load %arg3[%c0, %c0_0] : memref<4x128xf32, #tpu.memory_space<vmem>>, vector<4x128xf32>
    %c0_1 = arith.constant 0 : index
    %c0_2 = arith.constant 0 : index
    %1 = vector.load %arg4[%c0_1, %c0_2] : memref<4x128xf32, #tpu.memory_space<vmem>>, vector<4x128xf32>
    %2 = arith.addf %0, %1 : vector<4x128xf32>
    %c0_3 = arith.constant 0 : index
    %c0_4 = arith.constant 0 : index
    %3 = vector.load %arg5[%c0_3, %c0_4] : memref<4x128xf32, #tpu.memory_space<vmem>>, vector<4x128xf32>
    tpu.vector_store %arg5[%c0_3, %c0_4], %2 {strides = array<i32>} : memref<4x128xf32, #tpu.memory_space<vmem>>, vector<4x128xf32>,
    return
  }
  func.func @transform_0(%arg0: i32, %arg1: i32, %arg2: memref<1xi32, #tpu.memory_space<smem>>) -> (i32, i32) {
    %c0_i32 = arith.constant 0 : i32
    return %arg0, %arg1 : i32, i32
  }
  func.func @transform_1(%arg0: i32, %arg1: i32, %arg2: memref<1xi32, #tpu.memory_space<smem>>) -> (i32, i32) {
    %c0_i32 = arith.constant 0 : i32
    %c0_i32_0 = arith.constant 0 : i32
    return %arg0, %c0_i32 : i32, i32
  }
  func.func @transform_2(%arg0: i32, %arg1: i32, %arg2: memref<1xi32, #tpu.memory_space<smem>>) -> (i32, i32) {
    %c0_i32 = arith.constant 0 : i32
    return %arg0, %arg1 : i32, i32
  }
}

</mosaic_0001>

<bundles_post_ra>
// kernel: tpu_custom_call.1
= control target key start
LH: loop header
LB: loop body
LE: loop exit
PB: predicated region body
PF: predicated region fallthrough
CT: control target
= control target key end

     0   :  { %9 = vsyncpa [#allocation5], 0  ;;  %s144_s0 = inlined_call_operand.<no memory space> [shape: s32[1], index: 0, kind: input, shape index: {}]   ;;  %s145_s1 = inlined_call_operand.hbm [shape: f32[4,128], index: 1, kind: input, shape index: {}]   ;;  %s146_s2 = inlined_call_operand.vmem [shape: f32[4,128], index: 2, kind: input, shape index: {}]   ;;  %s147_s3 = inlined_call_operand.hbm [shape: f32[4,128], index: 3, kind: output, shape index: {}]  }
   0x1   :  { %10 = vsyncpa [#allocation6], 0  ;;  %s95_s12 = smov [#allocation4]   ;;  %s47_s16 = scalar_lea.hbm %s145_s1, 64 }
   0x2   :  { %s17_s13 = sshll.u32 %s95_s12, 4  ;;  %p48_p0 = scmp.ne.s32.totalorder %s145_s1, %s47_s16  ;;  %s18_s13 = int_to_ptr.vmem [resolvable:$true] %s17_s13 }
   0x3   :  { %p51_p1 = scmp.lt.u32.totalorder %s47_s16, %s145_s1 }
   0x5   :  { %p53_p2 = pnand %p51_p1, %p48_p0 }
   0x7   :  { %56 = shalt.err (!%p53_p2)
}
   0x8   :  { %s57_s20 = scalar_lea.vmem %s18_s13, 64  ;;  %p62_p4 = scmp.lt.s32.totalorder %s18_s13, %s18_s13 }
   0x9   :  { %p58_p3 = scmp.ne.s32.totalorder %s18_s13, %s57_s20  ;;  %p63_p5 = scmp.lt.s32.totalorder %s57_s20, %s57_s20 }
   0xb   :  { %p64_p6 = por %p63_p5, %p62_p4 }
   0xd   :  { %p65_p7 = pnand %p64_p6, %p58_p3 }
   0xf   :  { %68 = shalt.err (!%p65_p7)
}
  0x10   :  { %20 = dma.hbm_to_vmem [thread:$0]  %s145_s1, 64, %s18_s13, [#allocation5]  }
  0x11   :  { %91 = dma.done.wait [#allocation5], 64  }
  0x12   :  { %92 = vsyncadd [#allocation5], 4294967232  ;;  %s96_s23 = smov [#allocation7]   ;;  %v26_v0 = vld [vmem:[#allocation4] sm:$0xf] }
  0x13   :  { %s36_s24 = sshll.u32 %s96_s23, 4  ;;  %v27_v1 = vld [vmem:[%s146_s2] sm:$0xf]  ;;  %s37_s24 = int_to_ptr.vmem [resolvable:$true] %s36_s24 }
  0x14   :  { %v28_v2 = vadd.f32 %v27_v1, %v26_v0  ;;  %s69_s27 = scalar_lea.vmem %s37_s24, 64  ;;  %p74_p9 = scmp.lt.s32.totalorder %s37_s24, %s37_s24 }
  0x15   :  { %p70_p8 = scmp.ne.s32.totalorder %s37_s24, %s69_s27  ;;  %p75_p10 = scmp.lt.s32.totalorder %s69_s27, %s69_s27 }
  0x16   :  { %29 = vst [vmem:[#allocation7] sm:$0xf] %v28_v2 }
  0x17   :  { %p76_p11 = por %p75_p10, %p74_p9 }
  0x19   :  { %p77_p12 = pnand %p76_p11, %p70_p8 }
  0x1b   :  { %80 = shalt.err (!%p77_p12)
}
  0x1c   :  { %s81_s29 = scalar_lea.hbm %s147_s3, 64 }
  0x1d   :  { %p82_p13 = scmp.ne.s32.totalorder %s147_s3, %s81_s29  ;;  %p85_p0 = scmp.lt.u32.totalorder %s81_s29, %s147_s3 }
  0x1f   :  { %p87_p1 = pnand %p85_p0, %p82_p13 }
  0x21   :  { %90 = shalt.err (!%p87_p1)
}
  0x22   :  { %39 = dma.vmem_to_hbm [thread:$0]  %s37_s24, 64, %s147_s3, [#allocation6]  }
  0x23   :  { %93 = dma.done.wait [#allocation6], 64  }
  0x24   :  { %94 = vsyncadd [#allocation6], 4294967232 }
  0x25   :  { %43 = vsyncpa [#allocation5], 1 }
  0x26   :  { %44 = vsyncpa [#allocation6], 1 }

</bundles_post_ra>
